<compile_context>
chip_gen: v6e
topology: v6e:2x2x1
jax: 0.10.0
libtpu: 0.0.40
codegen_flags: <defaults>
</compile_context>

<pallas_src>
import functools

import jax
import jax.numpy as jnp
from jax import lax
from jax.experimental import pallas as pl
from jax.experimental.pallas import tpu as pltpu

NUM_LATENTS = 15
HIDDEN_DIM = 16
Y_DIM = 14

_PACK = 8              # data rows packed per lane group (packed path)
_CHUNK_BLOCK_ROWS = 512  # in-kernel strip-mine chunk size (block rows)
_MAX_BLOCK_ROWS = 4096   # ~8 MiB double-buffered in+out -> fits 16 MiB scoped VMEM


def _round_up(x: int, m: int) -> int:
    return (x + m - 1) // m * m


def _sublane(dtype) -> int:
    # f32 -> 8, bf16/f16 -> 16 (sub-32-bit dtypes pack along sublanes).
    return 16 if jnp.dtype(dtype).itemsize == 2 else 8


def _mlp_kernel(x_ref, w1_ref, b1_ref, w2_ref, b2_ref, o_ref, *, chunk, n_chunks):
    """out = relu(x @ w1 + b1) @ w2 + b2, strip-mined over row chunks."""
    # Weights/biases are tiny and resident; hoist the loads out of the loop.
    w1 = w1_ref[...]
    b1 = b1_ref[...]
    w2 = w2_ref[...]
    b2 = b2_ref[...]

    def body(c, carry):
        r0 = pl.multiple_of(c * chunk, chunk)
        x = x_ref[pl.ds(r0, chunk), :]
        h = jnp.dot(x, w1, preferred_element_type=jnp.float32) + b1
        h = jnp.maximum(h, 0.0)  # ReLU on the VPU
        y = jnp.dot(h, w2, preferred_element_type=jnp.float32) + b2
        o_ref[pl.ds(r0, chunk), :] = y.astype(o_ref.dtype)
        return carry

    if n_chunks == 1:
        body(0, 0)
    else:
        lax.fori_loop(0, n_chunks, body, 0, unroll=False)


def _run_mlp(x2d, w1, b1, w2, b2, *, max_block_rows):
    """Row-tiled fused MLP over a 2-D (rows, in_dim) array."""
    n, in_dim = x2d.shape
    hid = w1.shape[1]
    out_dim = w2.shape[1]
    align = _sublane(x2d.dtype)

    if n <= align:
        # Single full-array block (block dims equal to array dims are always legal).
        tile = n
    else:
        # >=2 grid steps when possible (v7x megacore), capped for VMEM
        # (~2 KB per block row of double-buffered, 128-lane-padded I/O).
        half = (n + 1) // 2
        tile = max(align, min(max_block_rows, _round_up(half, align)))
    chunk = min(_CHUNK_BLOCK_ROWS, tile)
    tile = _round_up(tile, chunk)
    n_chunks = tile // chunk
    grid = (pl.cdiv(n, tile),)  # no padding: Pallas masks the partial tail block

    kernel = functools.partial(_mlp_kernel, chunk=chunk, n_chunks=n_chunks)

    act_itemsize = jnp.dtype(x2d.dtype).itemsize
    w_itemsize = jnp.dtype(w1.dtype).itemsize
    cost = pl.CostEstimate(
        flops=2 * n * (in_dim * hid + hid * out_dim),
        transcendentals=0,
        bytes_accessed=n * (in_dim + out_dim) * act_itemsize
        + (w1.size + b1.size + w2.size + b2.size) * w_itemsize,
    )

    return pl.pallas_call(
        kernel,
        out_shape=jax.ShapeDtypeStruct((n, out_dim), x2d.dtype),
        grid_spec=pltpu.PrefetchScalarGridSpec(
            num_scalar_prefetch=0,
            grid=grid,
            in_specs=[
                # Activations: tiled along rows, double-buffered by Pallas.
                pl.BlockSpec((tile, in_dim), lambda i: (i, 0)),
                # Weights / biases: constant index_map -> resident, no re-DMA.
                pl.BlockSpec((in_dim, hid), lambda i: (0, 0)),
                pl.BlockSpec((1, hid), lambda i: (0, 0)),
                pl.BlockSpec((hid, out_dim), lambda i: (0, 0)),
                pl.BlockSpec((1, out_dim), lambda i: (0, 0)),
            ],
            out_specs=pl.BlockSpec((tile, out_dim), lambda i: (i, 0)),
        ),
        compiler_params=pltpu.CompilerParams(
            dimension_semantics=("parallel",),
        ),
        cost_estimate=cost,
    )(x2d, w1, b1, w2, b2)


@functools.partial(jax.jit, static_argnames=("max_block_rows",))
def mujoco_decoder_forward(z, w1, b1, w2, b2, *, max_block_rows=_MAX_BLOCK_ROWS):
    """z: (..., NUM_LATENTS) -> (..., Y_DIM)."""
    assert z.shape[-1] == NUM_LATENTS
    lead_shape = z.shape[:-1]
    n_rows = 1
    for d in lead_shape:
        n_rows *= d

    b1_2d = b1.reshape(1, HIDDEN_DIM)
    b2_2d = b2.reshape(1, Y_DIM)

    if n_rows >= _PACK and n_rows % _PACK == 0:
        # Packed path: 8 rows per lane group via a metadata-only reshape plus
        # block-diagonal weights (same HBM bytes, 8x lane density).
        groups = n_rows // _PACK
        z_p = z.reshape(groups, _PACK * NUM_LATENTS)
        eye = jnp.eye(_PACK, dtype=w1.dtype)
        w1_p = jnp.kron(eye, w1)                      # (120, 128) block-diagonal
        w2_p = jnp.kron(eye, w2)                      # (128, 112) block-diagonal
        b1_p = jnp.tile(b1_2d, (1, _PACK))            # (1, 128)
        b2_p = jnp.tile(b2_2d, (1, _PACK))            # (1, 112)
        out_p = _run_mlp(z_p, w1_p, b1_p, w2_p, b2_p, max_block_rows=max_block_rows)
        out2d = out_p.reshape(n_rows, Y_DIM)
    else:
        # Fallback (rows not a multiple of 8): unpacked rows, Pallas masks the
        # partial tail block -- still no padding / copy.
        z2d = z.reshape(n_rows, NUM_LATENTS)
        out2d = _run_mlp(z2d, w1, b1_2d, w2, b2_2d, max_block_rows=max_block_rows)

    return out2d.reshape(*lead_shape, Y_DIM)


def init_params(key):
    """Xavier-normal weights, zero biases (matches the module __init__).

    PyTorch Linear stores weight as (out, in) and computes x @ W^T + b; we keep
    the transposed (in, out) version so the kernel does x @ W + b directly.
    """
    k1, k2 = jax.random.split(key)
    std1 = (2.0 / (NUM_LATENTS + HIDDEN_DIM)) ** 0.5
    std2 = (2.0 / (HIDDEN_DIM + Y_DIM)) ** 0.5
    w1 = std1 * jax.random.normal(k1, (NUM_LATENTS, HIDDEN_DIM), jnp.float32)
    b1 = jnp.zeros((1, HIDDEN_DIM), jnp.float32)
    w2 = std2 * jax.random.normal(k2, (HIDDEN_DIM, Y_DIM), jnp.float32)
    b2 = jnp.zeros((1, Y_DIM), jnp.float32)
    return w1, b1, w2, b2


def reference_forward(z2d, w1, b1, w2, b2):
    h = jnp.maximum(z2d @ w1 + b1.reshape(-1), 0.0)
    return h @ w2 + b2.reshape(-1)


# TODO(synk): sigma2_y is a registered buffer unused by forward(); not modeled here.

if __name__ == "__main__":
    key = jax.random.PRNGKey(0)
    kp, kz = jax.random.split(key)
    w1, b1, w2, b2 = init_params(kp)

    # Small input (packed path, 16 rows -> 2 lane groups): (2, 8, 15) -> (2, 8, 14).
    z = jax.random.normal(kz, (2, 8, NUM_LATENTS), jnp.float32)
    out = jax.block_until_ready(mujoco_decoder_forward(z, w1, b1, w2, b2))
    ref = reference_forward(z.reshape(-1, NUM_LATENTS), w1, b1, w2, b2).reshape(
        2, 8, Y_DIM
    )
    assert out.shape == (2, 8, Y_DIM), out.shape
    assert jnp.allclose(out, ref, atol=1e-4, rtol=1e-4), "mismatch vs reference"

    # Rows not divisible by 8 -> unpacked fallback, masked tail block, 2 grid
    # steps, no padding copies (2100 rows).
    z_b = jax.random.normal(kz, (3, 700, NUM_LATENTS), jnp.float32)
    out_b = jax.block_until_ready(mujoco_decoder_forward(z_b, w1, b1, w2, b2))
    ref_b = reference_forward(
        z_b.reshape(-1, NUM_LATENTS), w1, b1, w2, b2
    ).reshape(3, 700, Y_DIM)
    assert out_b.shape == (3, 700, Y_DIM), out_b.shape
    assert jnp.allclose(out_b, ref_b, atol=1e-4, rtol=1e-4), "unpacked mismatch"

    # Packed path with multiple grid steps, multiple in-kernel chunks and a
    # partial (masked) tail block: 8320 rows = 1040 lane groups.
    z_c = jax.random.normal(kz, (16, 520, NUM_LATENTS), jnp.float32)
    out_c = jax.block_until_ready(mujoco_decoder_forward(z_c, w1, b1, w2, b2))
    ref_c = reference_forward(
        z_c.reshape(-1, NUM_LATENTS), w1, b1, w2, b2
    ).reshape(16, 520, Y_DIM)
    assert out_c.shape == (16, 520, Y_DIM), out_c.shape
    assert jnp.allclose(out_c, ref_c, atol=1e-4, rtol=1e-4), "packed mismatch"

    print("KERNEL_OK")
</pallas_src>

<mosaic_0001>
module attributes {stable_mosaic.version = 11 : i64} {
  func.func @_mlp_kernel(%arg0: i32, %arg1: memref<2x120xf32, #tpu.memory_space<vmem>>, %arg2: memref<120x128xf32, #tpu.memory_space<vmem>>, %arg3: memref<1x128xf32, #tpu.memory_space<vmem>>, %arg4: memref<128x112xf32, #tpu.memory_space<vmem>>, %arg5: memref<1x112xf32, #tpu.memory_space<vmem>>, %arg6: memref<2x112xf32, #tpu.memory_space<vmem>>) attributes {dimension_semantics = [#tpu.dimension_semantics<parallel>], iteration_bounds = array<i64: 1>, scalar_prefetch = 0 : i64, scratch_operands = 0 : i64, tpu.core_type = #tpu.core_type<tc>, window_params = [{transform_indices = @transform_0, window_bounds = array<i64: 2, 120>}, {pipeline_mode = #tpu.pipeline_mode<synchronous>, transform_indices = @transform_1, window_bounds = array<i64: 120, 128>}, {pipeline_mode = #tpu.pipeline_mode<synchronous>, transform_indices = @transform_2, window_bounds = array<i64: 1, 128>}, {pipeline_mode = #tpu.pipeline_mode<synchronous>, transform_indices = @transform_3, window_bounds = array<i64: 128, 112>}, {pipeline_mode = #tpu.pipeline_mode<synchronous>, transform_indices = @transform_4, window_bounds = array<i64: 1, 112>}, {transform_indices = @transform_5, window_bounds = array<i64: 2, 112>}]} {
    %c0 = arith.constant 0 : index
    %c0_0 = arith.constant 0 : index
    %0 = vector.load %arg2[%c0, %c0_0] : memref<120x128xf32, #tpu.memory_space<vmem>>, vector<120x128xf32>
    %c0_1 = arith.constant 0 : index
    %c0_2 = arith.constant 0 : index
    %1 = vector.load %arg3[%c0_1, %c0_2] : memref<1x128xf32, #tpu.memory_space<vmem>>, vector<1x128xf32>
    %c0_3 = arith.constant 0 : index
    %c0_4 = arith.constant 0 : index
    %2 = vector.load %arg4[%c0_3, %c0_4] : memref<128x112xf32, #tpu.memory_space<vmem>>, vector<128x112xf32>
    %c0_5 = arith.constant 0 : index
    %c0_6 = arith.constant 0 : index
    %3 = vector.load %arg5[%c0_5, %c0_6] : memref<1x112xf32, #tpu.memory_space<vmem>>, vector<1x112xf32>
    %c0_i32 = arith.constant 0 : i32
    %4 = tpu.assume_multiple %c0_i32, 2 : i32
    %5 = arith.index_cast %4 : i32 to index
    %c0_7 = arith.constant 0 : index
    %6 = vector.load %arg1[%5, %c0_7] : memref<2x120xf32, #tpu.memory_space<vmem>>, vector<2x120xf32>
    %cst = arith.constant dense<0.000000e+00> : vector<2x128xf32>
    %7 = tpu.matmul %6, %0, %cst {dimension_numbers = #tpu.dot_dimension_numbers<[1], [0], [0], [1], [0, 0, 1, 1], [], []>} : vector<2x120xf32>, vector<120x128xf32>, vector<2x128xf32> -> vector<2x128xf32>
    %8 = vector.broadcast %1 : vector<1x128xf32> to vector<2x128xf32>
    %9 = arith.addf %7, %8 : vector<2x128xf32>
    %cst_8 = arith.constant 0.000000e+00 : f32
    %10 = vector.broadcast %cst_8 : f32 to vector<2x128xf32>
    %11 = arith.maximumf %9, %10 : vector<2x128xf32>
    %cst_9 = arith.constant dense<0.000000e+00> : vector<2x112xf32>
    %12 = tpu.matmul %11, %2, %cst_9 {dimension_numbers = #tpu.dot_dimension_numbers<[1], [0], [0], [1], [0, 0, 1, 1], [], []>} : vector<2x128xf32>, vector<128x112xf32>, vector<2x112xf32> -> vector<2x112xf32>
    %13 = vector.broadcast %3 : vector<1x112xf32> to vector<2x112xf32>
    %14 = arith.addf %12, %13 : vector<2x112xf32>
    %15 = arith.index_cast %4 : i32 to index
    %c0_10 = arith.constant 0 : index
    %16 = vector.load %arg6[%15, %c0_10] : memref<2x112xf32, #tpu.memory_space<vmem>>, vector<2x112xf32>
    tpu.vector_store %arg6[%15, %c0_10], %14 {strides = array<i32>} : memref<2x112xf32, #tpu.memory_space<vmem>>, vector<2x112xf32>,
    return
  }
  func.func @transform_0(%arg0: i32) -> (i32, i32) {
    %c0_i32 = arith.constant 0 : i32
    %c0_i32_0 = arith.constant 0 : i32
    return %arg0, %c0_i32 : i32, i32
  }
  func.func @transform_1(%arg0: i32) -> (i32, i32) {
    %c0_i32 = arith.constant 0 : i32
    %c0_i32_0 = arith.constant 0 : i32
    %c0_i32_1 = arith.constant 0 : i32
    return %c0_i32, %c0_i32_0 : i32, i32
  }
  func.func @transform_2(%arg0: i32) -> (i32, i32) {
    %c0_i32 = arith.constant 0 : i32
    %c0_i32_0 = arith.constant 0 : i32
    %c0_i32_1 = arith.constant 0 : i32
    return %c0_i32, %c0_i32_0 : i32, i32
  }
  func.func @transform_3(%arg0: i32) -> (i32, i32) {
    %c0_i32 = arith.constant 0 : i32
    %c0_i32_0 = arith.constant 0 : i32
    %c0_i32_1 = arith.constant 0 : i32
    return %c0_i32, %c0_i32_0 : i32, i32
  }
  func.func @transform_4(%arg0: i32) -> (i32, i32) {
    %c0_i32 = arith.constant 0 : i32
    %c0_i32_0 = arith.constant 0 : i32
    %c0_i32_1 = arith.constant 0 : i32
    return %c0_i32, %c0_i32_0 : i32, i32
  }
  func.func @transform_5(%arg0: i32) -> (i32, i32) {
    %c0_i32 = arith.constant 0 : i32
    %c0_i32_0 = arith.constant 0 : i32
    return %arg0, %c0_i32 : i32, i32
  }
}

</mosaic_0001>

<bundles_post_ra>
// kernel: mujoco_decoder_forward.1
= control target key start
LH: loop header
LB: loop body
LE: loop exit
PB: predicated region body
PF: predicated region fallthrough
CT: control target
= control target key end

     0   :  { %v323_v0 = vmov 0.0   ;;  %vm324_vm0 = vmmov 0   ;;  %vm60_vm1 = vcmask 982016   ;;  %vm211_vm2 = vcmask 910336   ;;  %s493_s1 = inlined_call_operand.vmem [shape: f32[120,128], index: 1, kind: input, shape index: {}]   ;;  %s494_s3 = inlined_call_operand.vmem [shape: f32[128,112], index: 3, kind: input, shape index: {}]   ;;  %s495_s0 = inlined_call_operand.vmem [shape: f32[2,120], index: 0, kind: input, shape index: {}]   ;;  %s496_s2 = inlined_call_operand.vmem [shape: f32[1,128], index: 2, kind: input, shape index: {}]   ;;  %s497_s4 = inlined_call_operand.vmem [shape: f32[1,112], index: 4, kind: input, shape index: {}]   ;;  %s498_s5 = inlined_call_operand.vmem [shape: f32[2,112], index: 5, kind: output, shape index: {}]  }
   0x1   :  { %253 = vmatprep.subr.mxu0 %v323_v0  ;;  %v34_v1 = vld [vmem:[%s493_s1 + $0x70] sm:$0xff]  ;;  %v33_v2 = vld [vmem:[%s493_s1 + $0x68] sm:$0xff]  ;;  %283 = vmatprep.mubr.msk.f32.mxu0 %vm324_vm0, %v323_v0  ;;  %v32_v3 = vld [vmem:[%s493_s1 + $0x60] sm:$0xff] }
   0x2   :  { %254 = vmatpush3.msra.mxu0 %v34_v1  ;;  %286 = vmatprep.subr.mxu1 %v323_v0  ;;  %v31_v4 = vld [vmem:[%s493_s1 + $0x58] sm:$0xff]  ;;  %v50_v6 = vld [vmem:[%s494_s3 + $0x70] sm:$0xff]  ;;  %v49_v8 = vld [vmem:[%s494_s3 + $0x68] sm:$0xff] }
   0x3   :  { %255 = vmatprep.subr.mxu0 %v323_v0  ;;  %318 = vmatprep.mubr.msk.f32.mxu1 %vm324_vm0, %v323_v0  ;;  %v51_v5 = vld [vmem:[%s494_s3 + $0x78] sm:$0xff]  ;;  %v30_v7 = vld [vmem:[%s493_s1 + $0x50] sm:$0xff]  ;;  %v29_v9 = vld [vmem:[%s493_s1 + $0x48] sm:$0xff] }
   0x4   :  { %256 = vmatpush3.msra.mxu0 %v33_v2  ;;  %287 = vmatpush3.msra.mxu1 %v51_v5  ;;  %v48_v10 = vld [vmem:[%s494_s3 + $0x60] sm:$0xff]  ;;  %v47_v12 = vld [vmem:[%s494_s3 + $0x58] sm:$0xff]  ;;  %v46_v14 = vld [vmem:[%s494_s3 + $0x50] sm:$0xff] }
   0x5   :  { %257 = vmatprep.subr.mxu0 %v323_v0  ;;  %288 = vmatprep.subr.mxu1 %v323_v0  ;;  %v28_v11 = vld [vmem:[%s493_s1 + $0x40] sm:$0xff]  ;;  %v27_v13 = vld [vmem:[%s493_s1 + $0x38] sm:$0xff]  ;;  %v26_v15 = vld [vmem:[%s493_s1 + $0x30] sm:$0xff] }
   0x6   :  { %258 = vmatpush3.msra.mxu0 %v32_v3  ;;  %289 = vmatpush3.msra.mxu1 %v50_v6  ;;  %v45_v16 = vld [vmem:[%s494_s3 + $0x48] sm:$0xff]  ;;  %v44_v18 = vld [vmem:[%s494_s3 + $0x40] sm:$0xff]  ;;  %v43_v20 = vld [vmem:[%s494_s3 + $0x38] sm:$0xff] }
   0x7   :  { %259 = vmatprep.subr.mxu0 %v323_v0  ;;  %290 = vmatprep.subr.mxu1 %v323_v0  ;;  %v25_v17 = vld [vmem:[%s493_s1 + $0x28] sm:$0xff]  ;;  %v24_v19 = vld [vmem:[%s493_s1 + $0x20] sm:$0xff]  ;;  %v23_v21 = vld [vmem:[%s493_s1 + $0x18] sm:$0xff] }
   0x8   :  { %260 = vmatpush3.msra.mxu0 %v31_v4  ;;  %291 = vmatpush3.msra.mxu1 %v49_v8  ;;  %v42_v22 = vld [vmem:[%s494_s3 + $0x30] sm:$0xff]  ;;  %v41_v24 = vld [vmem:[%s494_s3 + $0x28] sm:$0xff]  ;;  %v40_v26 = vld [vmem:[%s494_s3 + $0x20] sm:$0xff] }
   0x9   :  { %261 = vmatprep.subr.mxu0 %v323_v0  ;;  %292 = vmatprep.subr.mxu1 %v323_v0  ;;  %v22_v23 = vld [vmem:[%s493_s1 + $0x10] sm:$0xff]  ;;  %v21_v25 = vld [vmem:[%s493_s1 + $0x8] sm:$0xff]  ;;  %v20_v27 = vld [vmem:[%s493_s1] sm:$0xff] }
   0xa   :  { %262 = vmatpush3.msra.mxu0 %v30_v7  ;;  %293 = vmatpush3.msra.mxu1 %v48_v10  ;;  %v53_v28 = vld [vmem:[%s495_s0] sm:$0x3]  ;;  %v39_v29 = vld [vmem:[%s494_s3 + $0x18] sm:$0xff]  ;;  %v38_v30 = vld [vmem:[%s494_s3 + $0x10] sm:$0xff] }
   0xb   :  { %263 = vmatprep.subr.mxu0 %v323_v0  ;;  %294 = vmatprep.subr.mxu1 %v323_v0  ;;  %v37_v31 = vld [vmem:[%s494_s3 + $0x8] sm:$0xff]  ;;  %v36_v32 = vld [vmem:[%s494_s3] sm:$0xff] }
   0xc   :  { %264 = vmatpush3.msra.mxu0 %v29_v9  ;;  %295 = vmatpush3.msra.mxu1 %v47_v12  ;;  %v217_v33 = vld [vmem:[%s496_s2] ss:$0 sm:$0xff] }
   0xd   :  { %265 = vmatprep.subr.mxu0 %v323_v0  ;;  %296 = vmatprep.subr.mxu1 %v323_v0  ;;  %v219_v38 = vld [vmem:[%s497_s4] ss:$0 sm:$0xff] }
   0xe   :  { %266 = vmatpush3.msra.mxu0 %v28_v11  ;;  %297 = vmatpush3.msra.mxu1 %v46_v14 }
   0xf   :  { %267 = vmatprep.subr.mxu0 %v323_v0  ;;  %298 = vmatprep.subr.mxu1 %v323_v0 }
  0x10   :  { %268 = vmatpush3.msra.mxu0 %v27_v13  ;;  %299 = vmatpush3.msra.mxu1 %v45_v16 }
  0x11   :  { %269 = vmatprep.subr.mxu0 %v323_v0  ;;  %300 = vmatprep.subr.mxu1 %v323_v0 }
  0x12   :  { %270 = vmatpush3.msra.mxu0 %v26_v15  ;;  %301 = vmatpush3.msra.mxu1 %v44_v18 }
  0x13   :  { %271 = vmatprep.subr.mxu0 %v323_v0  ;;  %302 = vmatprep.subr.mxu1 %v323_v0 }
  0x14   :  { %272 = vmatpush3.msra.mxu0 %v25_v17  ;;  %303 = vmatpush3.msra.mxu1 %v43_v20 }
  0x15   :  { %273 = vmatprep.subr.mxu0 %v323_v0  ;;  %304 = vmatprep.subr.mxu1 %v323_v0 }
  0x16   :  { %274 = vmatpush3.msra.mxu0 %v24_v19  ;;  %305 = vmatpush3.msra.mxu1 %v42_v22 }
  0x17   :  { %275 = vmatprep.subr.mxu0 %v323_v0  ;;  %306 = vmatprep.subr.mxu1 %v323_v0 }
  0x18   :  { %276 = vmatpush3.msra.mxu0 %v23_v21  ;;  %307 = vmatpush3.msra.mxu1 %v41_v24 }
  0x19   :  { %277 = vmatprep.subr.mxu0 %v323_v0  ;;  %308 = vmatprep.subr.mxu1 %v323_v0 }
  0x1a   :  { %278 = vmatpush3.msra.mxu0 %v22_v23  ;;  %309 = vmatpush3.msra.mxu1 %v40_v26 }
  0x1b   :  { %279 = vmatprep.subr.mxu0 %v323_v0  ;;  %310 = vmatprep.subr.mxu1 %v323_v0 }
  0x1c   :  { %280 = vmatpush3.msra.mxu0 %v21_v25  ;;  %311 = vmatpush3.msra.mxu1 %v39_v29 }
  0x1d   :  { %281 = vmatprep.subr.mxu0 %v323_v0  ;;  %312 = vmatprep.subr.mxu1 %v323_v0 }
  0x1e   :  { %282 = vmatpush3.msra.mxu0 %v20_v27  ;;  %313 = vmatpush3.msra.mxu1 %v38_v30 }
  0x1f   :  { %284 = vmatmul.mubr.msk.f32.vlgmr.msra.gmra.mxu0 %vm60_vm1, %v53_v28  ;;  %314 = vmatprep.subr.mxu1 %v323_v0 }
  0x20   :  { %315 = vmatpush3.msra.mxu1 %v37_v31 }
  0x21   :  { %316 = vmatprep.subr.mxu1 %v323_v0 }
  0x22   :  { %317 = vmatpush3.msra.mxu1 %v36_v32 }
  0xdf   :  { %v130_v34 = vpop.f32.mrf.mxu0 }
  0xe0   :  { %v131_v35 = vadd.f32 %v217_v33, %v130_v34 }
  0xe1   :  { %v285_v36 = vpop.f32.mrf.mxu0 }
  0xe2   :  { %v134_v37 = vmax.f32 %v131_v35, 0.0 }
  0xe4   :  { %319 = vmatmul.mubr.f32.vlgmr.msra.gmra.mxu1 %v134_v37 }
 0x1a4   :  { %v207_v39 = vpop.f32.mrf.mxu1 }
 0x1a5   :  { %v208_v40 = vadd.f32 %v219_v38, %v207_v39 }
 0x1a6   :  { %v320_v41 = vpop.f32.mrf.mxu1 }
 0x1a7   :  { %212 = vst.msk [vmem:[%s498_s5] sm:$0x3] %vm211_vm2, %v208_v40 }

</bundles_post_ra>
